<compile_context>
chip_gen: v5e
topology: v5e:2x2
jax: 0.10.0
libtpu: 0.0.40
codegen_flags: <defaults>
</compile_context>

<pallas_src>
import functools

import jax
import jax.numpy as jnp
from jax.experimental import pallas as pl
from jax.experimental.pallas import tpu as pltpu

EPS_BN = 1e-5


# ------------------------------- Pallas kernel -------------------------------

def _res_smlp_kernel(x_ref, wcat_ref, b1_ref, w2_ref, bout_ref, o_ref,
                     *, cout, has_shortcut):
    x = x_ref[...]                                     # (TM, Cin), native dtype

    # Fused first-stage matmul: x @ [Ws | W1]  (or just x @ W1 if no shortcut).
    fused = jnp.dot(x.astype(wcat_ref.dtype), wcat_ref[...],
                    preferred_element_type=jnp.float32)

    if has_shortcut:
        shortcut = fused[:, :cout]                     # (TM, Cout) = x @ Ws
        h_pre = fused[:, cout:]                        # (TM, Cin)  = x @ W1
    else:
        shortcut = x.astype(jnp.float32)               # identity residual
        h_pre = fused

    # smlp_1 bias + ReLU (f32 elementwise).
    h = jnp.maximum(h_pre + b1_ref[...], 0.0)

    # smlp_2 matmul (bf16 operands, f32 accumulate).
    y = jnp.dot(h.astype(w2_ref.dtype), w2_ref[...],
                preferred_element_type=jnp.float32)

    # residual add (biases b2 [+ bs] pre-folded into bout) + final ReLU.
    o_ref[...] = jnp.maximum(y + shortcut + bout_ref[...], 0.0).astype(o_ref.dtype)


# ------------------------------ tile selection --------------------------------

def _choose_tm(M, row_io_bytes, io_budget_bytes):
    """Largest power-of-two row tile whose double-buffered I/O fits the budget,
    while keeping >= 2 grid steps whenever M allows (v7x megacore)."""
    tm_cap = max(128, io_budget_bytes // max(row_io_bytes, 1))
    tm_cap = min(tm_cap, 4096)
    if M > 128:
        tm_cap = min(tm_cap, max(128, pl.cdiv(M, 2)))
    tm = 128
    while tm * 2 <= tm_cap:
        tm *= 2
    return tm


# --------------------------------- wrapper -----------------------------------

def res_smlp(x, fused, *, out_dtype=None, tm=None, io_budget_bytes=12 << 20):
    """x: (B, N, Cin); fused: pre-fused params from fuse_params()."""
    B, N, cin = x.shape
    wcat, b1, w2, bout = fused["wcat"], fused["b1"], fused["w2"], fused["bout"]
    cout = w2.shape[1]
    ncat = wcat.shape[1]
    has_shortcut = ncat > cin                 # [Ws|W1] is wider than W1 alone
    if not has_shortcut:
        assert cin == cout, "identity residual requires in_channels == out_channels"

    out_dtype = x.dtype if out_dtype is None else jnp.dtype(out_dtype)

    # --- flatten points, stream native dtype (no silent f32 upcast) ---
    M = B * N
    x2 = x.reshape(M, cin)

    x_bytes = jnp.dtype(x.dtype).itemsize
    o_bytes = jnp.dtype(out_dtype).itemsize
    row_io = 2 * (cin * x_bytes + cout * o_bytes)   # double-buffered in+out per row
    if tm is None:
        tm = _choose_tm(M, row_io, io_budget_bytes)

    grid_m = pl.cdiv(M, tm)
    m_pad = grid_m * tm
    if m_pad != M:                                   # masked-tail via padding
        x2 = jnp.pad(x2, ((0, m_pad - M), (0, 0)))

    # --- explicit scoped-VMEM limit (v5e default is only 16 MiB) ---
    param_bytes = (wcat.size * wcat.dtype.itemsize + w2.size * w2.dtype.itemsize
                   + b1.size * b1.dtype.itemsize + bout.size * bout.dtype.itemsize)
    temps = 4 * tm * (ncat + cin + 2 * cout)         # rough f32 intermediates
    vmem_limit = int(min(max(tm * row_io + 2 * param_bytes + 3 * temps + (4 << 20),
                             24 << 20), 64 << 20))

    kernel = functools.partial(_res_smlp_kernel, cout=cout,
                               has_shortcut=has_shortcut)

    out2 = pl.pallas_call(
        kernel,
        out_shape=jax.ShapeDtypeStruct((m_pad, cout), out_dtype),
        grid_spec=pltpu.PrefetchScalarGridSpec(
            num_scalar_prefetch=0,
            grid=(grid_m,),
            in_specs=[
                pl.BlockSpec((tm, cin), lambda i: (i, 0)),      # x rows
                pl.BlockSpec(wcat.shape, lambda i: (0, 0)),     # fused [Ws|W1]
                pl.BlockSpec(b1.shape, lambda i: (0, 0)),       # b1
                pl.BlockSpec(w2.shape, lambda i: (0, 0)),       # W2
                pl.BlockSpec(bout.shape, lambda i: (0, 0)),     # b2 (+ bs)
            ],
            out_specs=pl.BlockSpec((tm, cout), lambda i: (i, 0)),
        ),
        compiler_params=pltpu.CompilerParams(
            dimension_semantics=("parallel",),
            vmem_limit_bytes=vmem_limit),
    )(x2, wcat, b1, w2, bout)

    if m_pad != M:
        out2 = out2[:M]
    return out2.reshape(B, N, cout)


# ------------------- parameter construction & one-time fusion -----------------

def _smlp_params(key, ic, oc):
    """Effective (W_eff[ic, oc], b_eff[1, oc]) with eval-mode BatchNorm folded."""
    kw, kg, kb, km, kv = jax.random.split(key, 5)
    w = jax.random.normal(kw, (oc, ic), jnp.float32) / jnp.sqrt(jnp.float32(ic))
    gamma = 1.0 + 0.1 * jax.random.normal(kg, (oc,), jnp.float32)
    beta = 0.1 * jax.random.normal(kb, (oc,), jnp.float32)
    rmean = 0.1 * jax.random.normal(km, (oc,), jnp.float32)
    rvar = 0.5 + 0.1 * jnp.abs(jax.random.normal(kv, (oc,), jnp.float32))
    scale = gamma / jnp.sqrt(rvar + EPS_BN)
    w_eff = w.T * scale[None, :]                      # y = x @ w_eff
    b_eff = (beta - rmean * scale)[None, :]
    return w_eff, b_eff


def make_params(key, in_channels, out_channels):
    k1, k2, k3 = jax.random.split(key, 3)
    p = {}
    p["w1"], p["b1"] = _smlp_params(k1, in_channels, in_channels)
    p["w2"], p["b2"] = _smlp_params(k2, in_channels, out_channels)
    if in_channels != out_channels:
        p["ws"], p["bs"] = _smlp_params(k3, in_channels, out_channels)
    return p


def fuse_params(params, compute_dtype=jnp.bfloat16):
    """One-time prep: bf16 weight casts, [Ws|W1] concat, b2+bs bias fold."""
    cin = params["w1"].shape[0]
    cout = params["w2"].shape[1]
    w1 = params["w1"].astype(compute_dtype)           # (Cin, Cin)
    w2 = params["w2"].astype(compute_dtype)           # (Cin, Cout)
    b1 = params["b1"].astype(jnp.float32).reshape(1, cin)
    if "ws" in params:
        ws = params["ws"].astype(compute_dtype)       # (Cin, Cout)
        wcat = jnp.concatenate([ws, w1], axis=1)      # (Cin, Cout + Cin)
        bout = (params["b2"] + params["bs"]).astype(jnp.float32).reshape(1, cout)
    else:
        wcat = w1
        bout = params["b2"].astype(jnp.float32).reshape(1, cout)
    return {"wcat": wcat, "b1": b1, "w2": w2, "bout": bout}


# ----------------------------- pure-JAX reference ----------------------------

def reference(x, p):
    def lin(z, w, b):
        return jnp.einsum("bnc,cd->bnd", z, w) + b[None]

    h = jax.nn.relu(lin(x, p["w1"], p["b1"]))
    y = lin(h, p["w2"], p["b2"])
    s = lin(x, p["ws"], p["bs"]) if "ws" in p else x
    return jax.nn.relu(s + y)


# ------------------------------------ main ------------------------------------

if __name__ == "__main__":
    key = jax.random.PRNGKey(0)
    kx1, kp1, kx2, kp2 = jax.random.split(key, 4)

    run = jax.jit(res_smlp)                                        # f32 in/out
    run_bf16 = jax.jit(lambda xx, pp: res_smlp(xx, pp, out_dtype=jnp.bfloat16))

    # Case 1: in_channels != out_channels (shortcut SMLP; lane-dense 128-wide out)
    B, N, Cin, Cout = 2, 256, 64, 128
    x1 = jax.random.normal(kx1, (B, N, Cin), jnp.float32)
    p1 = make_params(kp1, Cin, Cout)
    f1 = fuse_params(p1)
    out1 = jax.block_until_ready(run(x1, f1))
    ref1 = reference(x1, p1)
    assert out1.shape == (B, N, Cout), out1.shape
    assert jnp.allclose(out1, ref1, rtol=5e-2, atol=5e-2), \
        f"shortcut case: max abs diff {jnp.max(jnp.abs(out1 - ref1))}"

    # Case 2: in_channels == out_channels (identity residual)
    Cin2 = Cout2 = 64
    x2 = jax.random.normal(kx2, (B, N, Cin2), jnp.float32)
    p2 = make_params(kp2, Cin2, Cout2)
    f2 = fuse_params(p2)
    out2 = jax.block_until_ready(run(x2, f2))
    ref2 = reference(x2, p2)
    assert out2.shape == (B, N, Cout2), out2.shape
    assert jnp.allclose(out2, ref2, rtol=5e-2, atol=5e-2), \
        f"identity case: max abs diff {jnp.max(jnp.abs(out2 - ref2))}"

    # Case 3: bf16 input/output streaming (halved HBM traffic; MXU already bf16)
    x1b = x1.astype(jnp.bfloat16)
    out3 = jax.block_until_ready(run_bf16(x1b, f1))
    ref3 = reference(x1b.astype(jnp.float32), p1)
    assert out3.shape == (B, N, Cout), out3.shape
    assert out3.dtype == jnp.bfloat16
    assert jnp.allclose(out3.astype(jnp.float32), ref3, rtol=1e-1, atol=1e-1), \
        f"bf16 I/O case: max abs diff {jnp.max(jnp.abs(out3.astype(jnp.float32) - ref3))}"

    print("KERNEL_OK")
</pallas_src>

<mosaic_0001>
module attributes {stable_mosaic.version = 11 : i64} {
  func.func @_res_smlp_kernel(%arg0: i32, %arg1: memref<256x64xf32, #tpu.memory_space<vmem>>, %arg2: memref<64x192xbf16, #tpu.memory_space<vmem>>, %arg3: memref<1x64xf32, #tpu.memory_space<vmem>>, %arg4: memref<64x128xbf16, #tpu.memory_space<vmem>>, %arg5: memref<1x128xf32, #tpu.memory_space<vmem>>, %arg6: memref<256x128xf32, #tpu.memory_space<vmem>>) attributes {dimension_semantics = [#tpu.dimension_semantics<parallel>], iteration_bounds = array<i64: 2>, scalar_prefetch = 0 : i64, scratch_operands = 0 : i64, tpu.core_type = #tpu.core_type<tc>, window_params = [{transform_indices = @transform_0, window_bounds = array<i64: 256, 64>}, {pipeline_mode = #tpu.pipeline_mode<synchronous>, transform_indices = @transform_1, window_bounds = array<i64: 64, 192>}, {pipeline_mode = #tpu.pipeline_mode<synchronous>, transform_indices = @transform_2, window_bounds = array<i64: 1, 64>}, {pipeline_mode = #tpu.pipeline_mode<synchronous>, transform_indices = @transform_3, window_bounds = array<i64: 64, 128>}, {pipeline_mode = #tpu.pipeline_mode<synchronous>, transform_indices = @transform_4, window_bounds = array<i64: 1, 128>}, {transform_indices = @transform_5, window_bounds = array<i64: 256, 128>}]} {
    %c0 = arith.constant 0 : index
    %c0_0 = arith.constant 0 : index
    %0 = vector.load %arg1[%c0, %c0_0] : memref<256x64xf32, #tpu.memory_space<vmem>>, vector<256x64xf32>
    %1 = arith.truncf %0 : vector<256x64xf32> to vector<256x64xbf16>
    %c0_1 = arith.constant 0 : index
    %c0_2 = arith.constant 0 : index
    %2 = vector.load %arg2[%c0_1, %c0_2] : memref<64x192xbf16, #tpu.memory_space<vmem>>, vector<64x192xbf16>
    %cst = arith.constant dense<0.000000e+00> : vector<256x192xf32>
    %3 = tpu.matmul %1, %2, %cst {dimension_numbers = #tpu.dot_dimension_numbers<[1], [0], [0], [1], [0, 0, 1, 1], [], []>} : vector<256x64xbf16>, vector<64x192xbf16>, vector<256x192xf32> -> vector<256x192xf32>
    %4 = vector.extract_strided_slice %3 {offsets = [0, 0], sizes = [256, 128], strides = [1, 1]} : vector<256x192xf32> to vector<256x128xf32>
    %5 = vector.extract_strided_slice %3 {offsets = [0, 128], sizes = [256, 64], strides = [1, 1]} : vector<256x192xf32> to vector<256x64xf32>
    %c0_3 = arith.constant 0 : index
    %c0_4 = arith.constant 0 : index
    %6 = vector.load %arg3[%c0_3, %c0_4] : memref<1x64xf32, #tpu.memory_space<vmem>>, vector<1x64xf32>
    %7 = vector.broadcast %6 : vector<1x64xf32> to vector<256x64xf32>
    %8 = arith.addf %5, %7 : vector<256x64xf32>
    %cst_5 = arith.constant 0.000000e+00 : f32
    %9 = vector.broadcast %cst_5 : f32 to vector<256x64xf32>
    %10 = arith.maximumf %8, %9 : vector<256x64xf32>
    %11 = arith.truncf %10 : vector<256x64xf32> to vector<256x64xbf16>
    %c0_6 = arith.constant 0 : index
    %c0_7 = arith.constant 0 : index
    %12 = vector.load %arg4[%c0_6, %c0_7] : memref<64x128xbf16, #tpu.memory_space<vmem>>, vector<64x128xbf16>
    %cst_8 = arith.constant dense<0.000000e+00> : vector<256x128xf32>
    %13 = tpu.matmul %11, %12, %cst_8 {dimension_numbers = #tpu.dot_dimension_numbers<[1], [0], [0], [1], [0, 0, 1, 1], [], []>} : vector<256x64xbf16>, vector<64x128xbf16>, vector<256x128xf32> -> vector<256x128xf32>
    %14 = arith.addf %13, %4 : vector<256x128xf32>
    %c0_9 = arith.constant 0 : index
    %c0_10 = arith.constant 0 : index
    %15 = vector.load %arg5[%c0_9, %c0_10] : memref<1x128xf32, #tpu.memory_space<vmem>>, vector<1x128xf32>
    %16 = vector.broadcast %15 : vector<1x128xf32> to vector<256x128xf32>
    %17 = arith.addf %14, %16 : vector<256x128xf32>
    %cst_11 = arith.constant 0.000000e+00 : f32
    %18 = vector.broadcast %cst_11 : f32 to vector<256x128xf32>
    %19 = arith.maximumf %17, %18 : vector<256x128xf32>
    %c0_12 = arith.constant 0 : index
    %c0_13 = arith.constant 0 : index
    %20 = vector.load %arg6[%c0_12, %c0_13] : memref<256x128xf32, #tpu.memory_space<vmem>>, vector<256x128xf32>
    tpu.vector_store %arg6[%c0_12, %c0_13], %19 {strides = array<i32>} : memref<256x128xf32, #tpu.memory_space<vmem>>, vector<256x128xf32>,
    return
  }
  func.func @transform_0(%arg0: i32) -> (i32, i32) {
    %c0_i32 = arith.constant 0 : i32
    %c0_i32_0 = arith.constant 0 : i32
    return %arg0, %c0_i32 : i32, i32
  }
  func.func @transform_1(%arg0: i32) -> (i32, i32) {
    %c0_i32 = arith.constant 0 : i32
    %c0_i32_0 = arith.constant 0 : i32
    %c0_i32_1 = arith.constant 0 : i32
    return %c0_i32, %c0_i32_0 : i32, i32
  }
  func.func @transform_2(%arg0: i32) -> (i32, i32) {
    %c0_i32 = arith.constant 0 : i32
    %c0_i32_0 = arith.constant 0 : i32
    %c0_i32_1 = arith.constant 0 : i32
    return %c0_i32, %c0_i32_0 : i32, i32
  }
  func.func @transform_3(%arg0: i32) -> (i32, i32) {
    %c0_i32 = arith.constant 0 : i32
    %c0_i32_0 = arith.constant 0 : i32
    %c0_i32_1 = arith.constant 0 : i32
    return %c0_i32, %c0_i32_0 : i32, i32
  }
  func.func @transform_4(%arg0: i32) -> (i32, i32) {
    %c0_i32 = arith.constant 0 : i32
    %c0_i32_0 = arith.constant 0 : i32
    %c0_i32_1 = arith.constant 0 : i32
    return %c0_i32, %c0_i32_0 : i32, i32
  }
  func.func @transform_5(%arg0: i32) -> (i32, i32) {
    %c0_i32 = arith.constant 0 : i32
    %c0_i32_0 = arith.constant 0 : i32
    return %arg0, %c0_i32 : i32, i32
  }
}

</mosaic_0001>

<bundles_post_ra>
// kernel: res_smlp.1
= control target key start
LH: loop header
LB: loop body
LE: loop exit
PB: predicated region body
PF: predicated region fallthrough
CT: control target
= control target key end

     0   :  { %10 = vsyncpa [#allocation3], 0  ;;  %s1616_s0 = inlined_call_operand.vmem [shape: f32[512,64], index: 0, kind: input, shape index: {}]   ;;  %s1617_s1 = inlined_call_operand.vmem [shape: bf16[64,192], index: 1, kind: input, shape index: {}]   ;;  %s1618_s2 = inlined_call_operand.vmem [shape: f32[1,64], index: 2, kind: input, shape index: {}]   ;;  %s1619_s3 = inlined_call_operand.vmem [shape: bf16[64,128], index: 3, kind: input, shape index: {}]   ;;  %s1620_s4 = inlined_call_operand.vmem [shape: f32[1,128], index: 4, kind: input, shape index: {}]   ;;  %s1621_s5 = inlined_call_operand.hbm [shape: f32[512,128], index: 5, kind: output, shape index: {}]  }
   0x1   :  { %12 = vsyncpa [#allocation3 + $0x1], 0  ;;  %s1253_s18 = smov 0   ;;  %s1255_s19 = smov 0  }
   0x2   :  { %s1257_s20 = smov 0   ;;  %s1259_s21 = smov 0  }
   0x3 LB: > { %s1274_s22 = sadd.s32 4294967295, %s1219_s21   ;;  %s981_s23 = sadd.s32 4294967294, %s1219_s21   ;;  %s1219_s21 = sphi %s1259_s21, %s1627_s21   ;;  %s1215_s20 = sphi %s1257_s20, %s1626_s20   ;;  %s1211_s19 = sphi %s1255_s19, %s1625_s19   ;;  %s1207_s18 = sphi %s1253_s18, %s1624_s18  }
   0x4   : > { %s1278_s24 = sadd.s32 1, %s1219_s21   ;;  %s135_s25 = sadd.s32 1, %s1215_s20 }
   0x5   : > { %s132_s26 = ssub.s32 %s1219_s21, %s1278_s24  ;;  %p145_p0 = scmp.ne.s32.totalorder %s1215_s20, %s1211_s19 }
   0x6   : > { %p133_p1 = scmp.eq.s32.totalorder %s132_s26, 0  ;;  %p146_p2 = scmp.eq.s32.totalorder %s1274_s22, 1 }
   0x7   : > { %p151_p3 = scmp.ne.s32.totalorder %s1211_s19, %s1207_s18  ;;  %p152_p4 = scmp.eq.s32.totalorder %s981_s23, 1 }
   0x8   : > { %s1289_s27 = scalar_select %p133_p1, %s1215_s20, %s135_s25  }
   0x9   : > { %p1291_p5 = por %p146_p2, %p145_p0  ;;  %p1295_p6 = por %p152_p4, %p151_p3 }
   0xa   : > { %p984_p7 = scmp.ge.s32.totalorder %s1219_s21, 1  ;;  %p191_p8 = scmp.lt.s32.totalorder %s1219_s21, 3 }
   0xc   : > { %p192_p9 = pnand %p984_p7, %p191_p8 }
   0xd   : > { %s986_s13 = sshll.u32 (!%p192_p9), %s1274_s22, 5  ;;  %s216_s26 = sand.u32 (!%p192_p9), 1, %s1211_s19  }
   0xe   : > { %195 = sbr.rel (%p192_p9) target bundleno = 504 (0x1f8), region = 40  ;;  %p220_p10 = scmp.lt.s32.totalorder (!%p192_p9), %s986_s13, 63 }
   0xf   : > { %s985_s7 = sshll.u32 (!%p192_p9), %s216_s26, 8  ;;  %s1177_s25 = scalar_lea.hbm (!%p192_p9), %s1621_s5, 512 }
  0x10   : > { %s1501_s8 = scalar_lea.vmem (!%p192_p9), [#allocation2], %s985_s7 }
  0x13   : > { %v1014_v0 = vld [vmem:[%s1617_s1 + $0x30] sm:$0xf]  ;;  %v1096_v1 = vld [vmem:[%s1617_s1 + $0x34] sm:$0xf0]  ;;  %v1095_v2 = vld [vmem:[%s1617_s1 + $0x34] sm:$0xf] }
  0x14   : > { %v1015_v3 = vor.u32 %v1096_v1, %v1014_v0  ;;  %v1016_v4 = vld [vmem:[%s1617_s1 + $0x38] sm:$0xf0]  ;;  %v1006_v5 = vld [vmem:[%s1617_s1 + $0x20] sm:$0xf]  ;;  %v1094_v6 = vld [vmem:[%s1617_s1 + $0x24] sm:$0xf0] }
  0x15   : > { %v1019_v7 = vor.u32 %v1095_v2, %v1016_v4  ;;  %v1093_v8 = vld [vmem:[%s1617_s1 + $0x24] sm:$0xf]  ;;  %v1008_v9 = vld [vmem:[%s1617_s1 + $0x28] sm:$0xf0]  ;;  %v1007_v10 = vor.u32 %v1094_v6, %v1006_v5  ;;  %v998_v12 = vld [vmem:[%s1617_s1 + $0x10] sm:$0xf] }
  0x16   : > { %1102 = vmatpush.bf16.msra.mxu3 %v1015_v3  ;;  %376 = vmatpush.bf16.msra.mxu0 %v1015_v3  ;;  %v1011_v11 = vor.u32 %v1093_v8, %v1008_v9  ;;  %v1092_v13 = vld [vmem:[%s1617_s1 + $0x14] sm:$0xf0]  ;;  %v1091_v14 = vld [vmem:[%s1617_s1 + $0x14] sm:$0xf]  ;;  %v1000_v15 = vld [vmem:[%s1617_s1 + $0x18] sm:$0xf0] }
  0x17   : > { %465 = vmatpush.bf16.msra.mxu1 %v1019_v7  ;;  %v999_v16 = vor.u32 %v1092_v13, %v998_v12  ;;  %v1003_v17 = vor.u32 %v1091_v14, %v1000_v15  ;;  %v990_v18 = vld [vmem:[%s1617_s1] sm:$0xf]  ;;  %v1090_v19 = vld [vmem:[%s1617_s1 + $0x4] sm:$0xf0]  ;;  %s1629_s13 = smov (!%p220_p10, %s986_s13), 63  ;;  %vm323_vm0 = vcmask 523264  }
  0x18   : > { %v1089_v20 = vld [vmem:[%s1617_s1 + $0x4] sm:$0xf]  ;;  %v992_v21 = vld [vmem:[%s1617_s1 + $0x8] sm:$0xf0]  ;;  %s987_s6 = sshll.u32 %s1629_s13, 3  ;;  %v991_v22 = vor.u32 %v1090_v19, %v990_v18  ;;  %v1100_v56 = vld [vmem:[%s1619_s3 + $0x18] sm:$0xff] }
  0x19   : > { %s1353_s9 = scalar_lea.vmem %s1616_s0, %s987_s6  ;;  %v995_v23 = vor.u32 %v1089_v20, %v992_v21  ;;  %718 = vmatpush.bf16.msra.mxu2 %v1100_v56  ;;  %v1099_v58 = vld [vmem:[%s1619_s3 + $0x10] sm:$0xff]  ;;  %v1098_v59 = vld [vmem:[%s1619_s3 + $0x8] sm:$0xff]  ;;  %v1097_v60 = vld [vmem:[%s1619_s3] sm:$0xff]  ;;  %s916_s13 = sshll.u32 %s1501_s8, 4  ;;  %s917_s13 = int_to_ptr.vmem [resolvable:$true] %s916_s13 }
  0x1a   : > { %1103 = vmatpush.bf16.msra.mxu3 %v1007_v10  ;;  %377 = vmatpush.bf16.msra.mxu0 %v1007_v10  ;;  %v251_v24 = vld [vmem:[%s1353_s9 + $0xc0] sm:$0xff]  ;;  %v252_v25 = vld [vmem:[%s1353_s9 + $0xc8] sm:$0xff]  ;;  %v253_v30 = vld [vmem:[%s1353_s9 + $0xd0] sm:$0xff] }
  0x1b   : > { %466 = vmatpush.bf16.msra.mxu1 %v1011_v11  ;;  %v227_v26 = vld [vmem:[%s1353_s9] sm:$0xff]  ;;  %v228_v27 = vld [vmem:[%s1353_s9 + $0x8] sm:$0xff]  ;;  %v271_v28 = vpack.c.bf16 %v252_v25, %v251_v24  ;;  %v254_v31 = vld [vmem:[%s1353_s9 + $0xd8] sm:$0xff] }
  0x1c   : > { %v259_v29 = vpack.c.bf16 %v228_v27, %v227_v26  ;;  %v229_v32 = vld [vmem:[%s1353_s9 + $0x10] sm:$0xff]  ;;  %v230_v33 = vld [vmem:[%s1353_s9 + $0x18] sm:$0xff]  ;;  %v272_v34 = vpack.c.bf16 %v254_v31, %v253_v30  ;;  %v255_v36 = vld [vmem:[%s1353_s9 + $0xe0] sm:$0xff] }
  0x1d   : > { %v260_v35 = vpack.c.bf16 %v230_v33, %v229_v32  ;;  %v256_v37 = vld [vmem:[%s1353_s9 + $0xe8] sm:$0xff]  ;;  %v231_v38 = vld [vmem:[%s1353_s9 + $0x20] sm:$0xff]  ;;  %v257_v42 = vld [vmem:[%s1353_s9 + $0xf0] sm:$0xff]  ;;  %719 = vmatpush.bf16.msra.mxu2 %v1099_v58 }
  0x1e   : > { %1104 = vmatpush.bf16.msra.mxu3 %v999_v16  ;;  %378 = vmatpush.bf16.msra.mxu0 %v999_v16  ;;  %v232_v39 = vld [vmem:[%s1353_s9 + $0x28] sm:$0xff]  ;;  %v273_v40 = vpack.c.bf16 %v256_v37, %v255_v36  ;;  %v258_v43 = vld [vmem:[%s1353_s9 + $0xf8] sm:$0xff]  ;;  %v233_v44 = vld [vmem:[%s1353_s9 + $0x30] sm:$0xff] }
  0x1f   : > { %467 = vmatpush.bf16.msra.mxu1 %v1003_v17  ;;  %v261_v41 = vpack.c.bf16 %v232_v39, %v231_v38  ;;  %v234_v45 = vld [vmem:[%s1353_s9 + $0x38] sm:$0xff]  ;;  %v274_v46 = vpack.c.bf16 %v258_v43, %v257_v42  ;;  %v235_v48 = vld [vmem:[%s1353_s9 + $0x40] sm:$0xff]  ;;  %v236_v49 = vld [vmem:[%s1353_s9 + $0x48] sm:$0xff] }
  0x20   : > { %v262_v47 = vpack.c.bf16 %v234_v45, %v233_v44  ;;  %v263_v50 = vpack.c.bf16 %v236_v49, %v235_v48  ;;  %v237_v51 = vld [vmem:[%s1353_s9 + $0x50] sm:$0xff]  ;;  %v238_v52 = vld [vmem:[%s1353_s9 + $0x58] sm:$0xff]  ;;  %v239_v54 = vld [vmem:[%s1353_s9 + $0x60] sm:$0xff] }
  0x21   : > { %v264_v53 = vpack.c.bf16 %v238_v52, %v237_v51  ;;  %v240_v55 = vld [vmem:[%s1353_s9 + $0x68] sm:$0xff]  ;;  %720 = vmatpush.bf16.msra.mxu2 %v1098_v59  ;;  %v241_v61 = vld [vmem:[%s1353_s9 + $0x70] sm:$0xff]  ;;  %v242_v62 = vld [vmem:[%s1353_s9 + $0x78] sm:$0xff] }
  0x22   : > { %1105 = vmatpush.bf16.msra.mxu3 %v991_v22  ;;  %379 = vmatpush.bf16.msra.mxu0 %v991_v22  ;;  %v265_v57 = vpack.c.bf16 %v240_v55, %v239_v54  ;;  %v266_v63 = vpack.c.bf16 %v242_v62, %v241_v61  ;;  %v243_v0 = vld [vmem:[%s1353_s9 + $0x80] sm:$0xff]  ;;  %v244_v1 = vld [vmem:[%s1353_s9 + $0x88] sm:$0xff]  ;;  %v246_v12 = vld [vmem:[%s1353_s9 + $0x98] sm:$0xff] }
  0x23   : > { %468 = vmatpush.bf16.msra.mxu1 %v995_v23  ;;  %v267_v2 = vpack.c.bf16 %v244_v1, %v243_v0  ;;  %v1421_v4 = vld [vmem:[%s1618_s2] ss:$0 sm:$0xff]  ;;  %v248_v24 = vld [vmem:[%s1353_s9 + $0xa8] sm:$0xff]  ;;  %v250_v36 = vld [vmem:[%s1353_s9 + $0xb8] sm:$0xff] }
  0x25   : > { %1032 = vmatmul.msk.bf16.vlgmr.msra.gmra.mxu3 %vm323_vm0, %v271_v28  ;;  %1020 = vmatmul.msk.bf16.vlgmr.msra.gmra.mxu0 %vm323_vm0, %v259_v29 }
  0x26   : > { %1106 = vmatpush.bf16.msrb.mxu3 %v1019_v7  ;;  %1036 = vmatmul.msk.bf16.vlgmr.msra.gmra.mxu1 %vm323_vm0, %v259_v29 }
  0x27   : > { %721 = vmatpush.bf16.msra.mxu2 %v1097_v60 }
  0x2a   : > { %1107 = vmatpush.bf16.msrb.mxu3 %v1011_v11  ;;  %v245_v11 = vld [vmem:[%s1353_s9 + $0x90] sm:$0xff] }
  0x2b   : > { %v268_v15 = vpack.c.bf16 %v246_v12, %v245_v11 }
  0x2e   : > { %1108 = vmatpush.bf16.msrb.mxu3 %v1003_v17 }
  0x32   : > { %1109 = vmatpush.bf16.msrb.mxu3 %v995_v23  ;;  %v247_v23 = vld [vmem:[%s1353_s9 + $0xa0] sm:$0xff] }
  0x33   : > { %v269_v27 = vpack.c.bf16 %v248_v24, %v247_v23 }
  0x35   : > { %1033 = vmatmul.msk.bf16.gmra.mxu3 %vm323_vm0, %v272_v34  ;;  %1021 = vmatmul.msk.bf16.gmra.mxu0 %vm323_vm0, %v260_v35 }
  0x36   : > { %1037 = vmatmul.msk.bf16.gmra.mxu1 %vm323_vm0, %v260_v35  ;;  %1110 = vmatpush.bf16.msra.mxu3 %v1100_v56  ;;  %v249_v35 = vld [vmem:[%s1353_s9 + $0xb0] sm:$0xff]  ;;  %s1101_s9 = sshll.u32 %s1274_s22, 8  ;;  %s904_s22 = scalar_lea.sflag [#allocation3], %s216_s26 }
  0x37   : > { %v270_v39 = vpack.c.bf16 %v250_v36, %v249_v35  ;;  %s915_s12 = scalar_lea.hbm %s1621_s5, %s1101_s9 }
  0x38   : > { %s918_s14 = sshll.u32 %s915_s12, 4  ;;  %s919_s14 = int_to_ptr.hbm [resolvable:$true] %s918_s14 }
  0x39   : > { %s1171_s15 = sshra.s32 %s919_s14, 4  ;;  %s1172_s15 = int_to_ptr.hbm [resolvable:$true] %s1171_s15 }
  0x3a   : > { %1111 = vmatpush.bf16.msra.mxu3 %v1099_v58  ;;  %s1173_s16 = scalar_lea.hbm %s1172_s15, 256  ;;  %p1178_p0 = scmp.lt.s32.totalorder %s1172_s15, %s1621_s5 }
  0x3b   : > { %p1174_p11 = scmp.ne.s32.totalorder %s1172_s15, %s1173_s16  ;;  %p1179_p1 = scmp.lt.s32.totalorder %s1177_s25, %s1173_s16 }
  0x3d   : > { %p1175_p12 = pnand %p1174_p11, %p1291_p5  ;;  %p1180_p2 = por %p1179_p1, %p1178_p0 }
  0x3e   : > { %1112 = vmatpush.bf16.msra.mxu3 %v1098_v59 }
  0x3f   : > { %p1176_p13 = pneg %p1175_p12 }
  0x41   : > { %p1181_p3 = pnand %p1180_p2, %p1176_p13 }
  0x42   : > { %1113 = vmatpush.bf16.msra.mxu3 %v1097_v60 }
  0x45   : > { %1034 = vmatmul.msk.bf16.gmra.mxu3 %vm323_vm0, %v273_v40  ;;  %1022 = vmatmul.msk.bf16.gmra.mxu0 %vm323_vm0, %v261_v41 }
  0x46   : > { %1038 = vmatmul.msk.bf16.gmra.mxu1 %vm323_vm0, %v261_v41 }
  0x55   : > { %1035 = vmatmul.msk.bf16.gmra.mxu3 %vm323_vm0, %v274_v46  ;;  %1023 = vmatmul.msk.bf16.gmra.mxu0 %vm323_vm0, %v262_v47 }
  0x56   : > { %1039 = vmatmul.msk.bf16.gmra.mxu1 %vm323_vm0, %v262_v47 }
  0x65   : > { %1048 = vmatmul.msk.bf16.vlgmr.msrb.gmra.mxu3 %vm323_vm0, %v271_v28  ;;  %1024 = vmatmul.msk.bf16.gmra.mxu0 %vm323_vm0, %v263_v50 }
  0x66   : > { %1040 = vmatmul.msk.bf16.gmra.mxu1 %vm323_vm0, %v263_v50 }
  0x75   : > { %1049 = vmatmul.msk.bf16.gmra.mxu3 %vm323_vm0, %v272_v34  ;;  %1025 = vmatmul.msk.bf16.gmra.mxu0 %vm323_vm0, %v264_v53 }
  0x76   : > { %1041 = vmatmul.msk.bf16.gmra.mxu1 %vm323_vm0, %v264_v53 }
  0x85   : > { %1050 = vmatmul.msk.bf16.gmra.mxu3 %vm323_vm0, %v273_v40  ;;  %1026 = vmatmul.msk.bf16.gmra.mxu0 %vm323_vm0, %v265_v57 }
  0x86   : > { %1042 = vmatmul.msk.bf16.gmra.mxu1 %vm323_vm0, %v265_v57 }
  0x95   : > { %1051 = vmatmul.msk.bf16.gmra.mxu3 %vm323_vm0, %v274_v46  ;;  %1027 = vmatmul.msk.bf16.gmra.mxu0 %vm323_vm0, %v266_v63 }
  0x96   : > { %1043 = vmatmul.msk.bf16.gmra.mxu1 %vm323_vm0, %v266_v63 }
  0xa2   : > { %v381_v23 = vpop.f32.mrf.mxu0 }
  0xa3   : > { %v470_v3 = vpop.f32.mrf.mxu1 }
  0xa4   : > { %v554_v6 = vadd.f32 %v1421_v4, %v470_v3 }
  0xa5   : > { %1028 = vmatmul.msk.bf16.gmra.mxu0 %vm323_vm0, %v267_v2 }
  0xa6   : > { %1044 = vmatmul.msk.bf16.gmra.mxu1 %vm323_vm0, %v267_v2  ;;  %v586_v9 = vmax.f32 %v554_v6, 0.0 }
  0xa8   : > { %v1424_v5 = vpop.f32.mrf.mxu3 }
  0xaa   : > { %v383_v35 = vpop.f32.mrf.mxu0 }
  0xab   : > { %v472_v7 = vpop.f32.mrf.mxu1 }
  0xac   : > { %v555_v8 = vadd.f32 %v1421_v4, %v472_v7 }
  0xae   : > { %v587_v10 = vmax.f32 %v555_v8, 0.0 }
  0xb0   : > { %v618_v13 = vpack.c.bf16 %v587_v10, %v586_v9  ;;  %v1430_v14 = vpop.f32.mrf.mxu3 }
  0xb2   : > { %1068 = vmatmul.msk.bf16.vlgmr.msra.gmra.mxu2 %vm323_vm0, %v618_v13 }
  0xb3   : > { %v475_v16 = vpop.f32.mrf.mxu1 }
  0xb4   : > { %v556_v18 = vadd.f32 %v1421_v4, %v475_v16 }
  0xb5   : > { %1029 = vmatmul.msk.bf16.gmra.mxu0 %vm323_vm0, %v268_v15 }
  0xb6   : > { %1045 = vmatmul.msk.bf16.gmra.mxu1 %vm323_vm0, %v268_v15  ;;  %v588_v21 = vmax.f32 %v556_v18, 0.0 }
  0xb8   : > { %v1435_v17 = vpop.f32.mrf.mxu3 }
  0xbb   : > { %v477_v19 = vpop.f32.mrf.mxu1 }
  0xbc   : > { %v557_v20 = vadd.f32 %v1421_v4, %v477_v19 }
  0xbe   : > { %v589_v22 = vmax.f32 %v557_v20, 0.0 }
  0xc0   : > { %v619_v25 = vpack.c.bf16 %v589_v22, %v588_v21  ;;  %v1441_v26 = vpop.f32.mrf.mxu3 }
  0xc2   : > { %1069 = vmatmul.msk.bf16.gmra.mxu2 %vm323_vm0, %v619_v25 }
  0xc3   : > { %v480_v28 = vpop.f32.mrf.mxu1 }
  0xc4   : > { %v558_v30 = vadd.f32 %v1421_v4, %v480_v28 }
  0xc5   : > { %1030 = vmatmul.msk.bf16.gmra.mxu0 %vm323_vm0, %v269_v27 }
  0xc6   : > { %1046 = vmatmul.msk.bf16.gmra.mxu1 %vm323_vm0, %v269_v27  ;;  %v590_v33 = vmax.f32 %v558_v30, 0.0 }
  0xc8   : > { %v1446_v29 = vpop.f32.mrf.mxu3 }
  0xcb   : > { %v482_v31 = vpop.f32.mrf.mxu1 }
  0xcc   : > { %v559_v32 = vadd.f32 %v1421_v4, %v482_v31 }
  0xce   : > { %v591_v34 = vmax.f32 %v559_v32, 0.0 }
  0xd0   : > { %v620_v37 = vpack.c.bf16 %v591_v34, %v590_v33  ;;  %v1452_v38 = vpop.f32.mrf.mxu3 }
  0xd2   : > { %1070 = vmatmul.msk.bf16.gmra.mxu2 %vm323_vm0, %v620_v37 }
  0xd3   : > { %v485_v40 = vpop.f32.mrf.mxu1 }
  0xd4   : > { %v560_v42 = vadd.f32 %v1421_v4, %v485_v40 }
  0xd5   : > { %1031 = vmatmul.msk.bf16.gmra.mxu0 %vm323_vm0, %v270_v39 }
  0xd6   : > { %1047 = vmatmul.msk.bf16.gmra.mxu1 %vm323_vm0, %v270_v39  ;;  %v592_v45 = vmax.f32 %v560_v42, 0.0 }
  0xd8   : > { %v1457_v41 = vpop.f32.mrf.mxu3 }
  0xdb   : > { %v487_v43 = vpop.f32.mrf.mxu1 }
  0xdc   : > { %v561_v44 = vadd.f32 %v1421_v4, %v487_v43  ;;  %v386_v43 = vpop.f32.mrf.mxu0 }
  0xde   : > { %v593_v46 = vmax.f32 %v561_v44, 0.0 }
  0xe0   : > { %v621_v47 = vpack.c.bf16 %v593_v46, %v592_v45  ;;  %v1461_v48 = vpop.f32.mrf.mxu3 }
  0xe2   : > { %1071 = vmatmul.msk.bf16.gmra.mxu2 %vm323_vm0, %v621_v47 }
  0xe3   : > { %v490_v49 = vpop.f32.mrf.mxu1 }
  0xe4   : > { %v562_v51 = vadd.f32 %v1421_v4, %v490_v49 }
  0xe6   : > { %v594_v55 = vmax.f32 %v562_v51, 0.0 }
  0xe8   : > { %v530_v50 = vpop.f32.mrf.mxu3 }
  0xe9   : > { %v578_v54 = vadd.f32 %v1421_v4, %v530_v50 }
  0xeb   : > { %v492_v52 = vpop.f32.mrf.mxu1  ;;  %v610_v59 = vmax.f32 %v578_v54, 0.0  ;;  %v388_v54 = vpop.f32.mrf.mxu0 }
  0xec   : > { %v563_v53 = vadd.f32 %v1421_v4, %v492_v52 }
  0xee   : > { %v595_v56 = vmax.f32 %v563_v53, 0.0 }
  0xf0   : > { %v622_v57 = vpack.c.bf16 %v595_v56, %v594_v55  ;;  %v532_v58 = vpop.f32.mrf.mxu3 }
  0xf1   : > { %v579_v60 = vadd.f32 %v1421_v4, %v532_v58 }
  0xf2   : > { %1072 = vmatmul.msk.bf16.gmra.mxu2 %vm323_vm0, %v622_v57 }
  0xf3   : > { %v611_v61 = vmax.f32 %v579_v60, 0.0  ;;  %v495_v62 = vpop.f32.mrf.mxu1  ;;  %v391_v60 = vpop.f32.mrf.mxu0 }
  0xf4   : > { %v564_v1 = vadd.f32 %v1421_v4, %v495_v62 }
  0xf5   : > { %v630_v63 = vpack.c.bf16 %v611_v61, %v610_v59 }
  0xf6   : > { %v596_v7 = vmax.f32 %v564_v1, 0.0 }
  0xf7   : > { %1080 = vmatmul.msk.bf16.vlgmr.msra.gmra.mxu3 %vm323_vm0, %v630_v63  ;;  %v1495_v63 = vld [vmem:[%s1620_s4] ss:$0 sm:$0xff] }
  0xf8   : > { %v535_v0 = vpop.f32.mrf.mxu3 }
  0xf9   : > { %v580_v6 = vadd.f32 %v1421_v4, %v535_v0 }
  0xfb   : > { %v497_v2 = vpop.f32.mrf.mxu1  ;;  %v612_v11 = vmax.f32 %v580_v6, 0.0 }
  0xfc   : > { %v565_v3 = vadd.f32 %v1421_v4, %v497_v2 }
  0xfe   : > { %v597_v8 = vmax.f32 %v565_v3, 0.0  ;;  %v393_v3 = vpop.f32.mrf.mxu0 }
 0x100   : > { %v623_v9 = vpack.c.bf16 %v597_v8, %v596_v7  ;;  %v537_v10 = vpop.f32.mrf.mxu3 }
 0x101   : > { %v581_v12 = vadd.f32 %v1421_v4, %v537_v10 }
 0x102   : > { %1073 = vmatmul.msk.bf16.gmra.mxu2 %vm323_vm0, %v623_v9 }
 0x103   : > { %v613_v13 = vmax.f32 %v581_v12, 0.0  ;;  %v500_v15 = vpop.f32.mrf.mxu1 }
 0x104   : > { %v566_v19 = vadd.f32 %v1421_v4, %v500_v15 }
 0x105   : > { %v631_v16 = vpack.c.bf16 %v613_v13, %v612_v11 }
 0x106   : > { %v598_v24 = vmax.f32 %v566_v19, 0.0 }
 0x107   : > { %1081 = vmatmul.msk.bf16.gmra.mxu3 %vm323_vm0, %v631_v16 }
 0x108   : > { %v540_v18 = vpop.f32.mrf.mxu3 }
 0x109   : > { %v582_v22 = vadd.f32 %v1421_v4, %v540_v18 }
 0x10b   : > { %v502_v20 = vpop.f32.mrf.mxu1  ;;  %v614_v30 = vmax.f32 %v582_v22, 0.0 }
 0x10c   : > { %v567_v21 = vadd.f32 %v1421_v4, %v502_v20  ;;  %v396_v20 = vpop.f32.mrf.mxu0 }
 0x10e   : > { %v599_v25 = vmax.f32 %v567_v21, 0.0 }
 0x110   : > { %v624_v27 = vpack.c.bf16 %v599_v25, %v598_v24  ;;  %v542_v28 = vpop.f32.mrf.mxu3 }
 0x111   : > { %v583_v31 = vadd.f32 %v1421_v4, %v542_v28 }
 0x112   : > { %1074 = vmatmul.msk.bf16.gmra.mxu2 %vm323_vm0, %v624_v27 }
 0x113   : > { %v615_v32 = vmax.f32 %v583_v31, 0.0  ;;  %v505_v33 = vpop.f32.mrf.mxu1 }
 0x114   : > { %v568_v37 = vadd.f32 %v1421_v4, %v505_v33  ;;  %v398_v31 = vpop.f32.mrf.mxu0 }
 0x115   : > { %v632_v34 = vpack.c.bf16 %v615_v32, %v614_v30 }
 0x116   : > { %v600_v44 = vmax.f32 %v568_v37, 0.0 }
 0x117   : > { %1082 = vmatmul.msk.bf16.gmra.mxu3 %vm323_vm0, %v632_v34 }
 0x118   : > { %v545_v36 = vpop.f32.mrf.mxu3 }
 0x119   : > { %v584_v42 = vadd.f32 %v1421_v4, %v545_v36 }
 0x11b   : > { %v507_v39 = vpop.f32.mrf.mxu1  ;;  %v616_v49 = vmax.f32 %v584_v42, 0.0 }
 0x11c   : > { %v569_v40 = vadd.f32 %v1421_v4, %v507_v39 }
 0x11e   : > { %v601_v45 = vmax.f32 %v569_v40, 0.0 }
 0x120   : > { %v625_v46 = vpack.c.bf16 %v601_v45, %v600_v44  ;;  %v547_v47 = vpop.f32.mrf.mxu3 }
 0x121   : > { %v585_v50 = vadd.f32 %v1421_v4, %v547_v47 }
 0x122   : > { %1075 = vmatmul.msk.bf16.gmra.mxu2 %vm323_vm0, %v625_v46 }
 0x123   : > { %v617_v51 = vmax.f32 %v585_v50, 0.0  ;;  %v510_v52 = vpop.f32.mrf.mxu1 }
 0x124   : > { %v570_v55 = vadd.f32 %v1421_v4, %v510_v52 }
 0x125   : > { %v633_v53 = vpack.c.bf16 %v617_v51, %v616_v49 }
 0x126   : > { %v602_v58 = vmax.f32 %v570_v55, 0.0 }
 0x127   : > { %1083 = vmatmul.msk.bf16.gmra.mxu3 %vm323_vm0, %v633_v53 }
 0x12b   : > { %v512_v56 = vpop.f32.mrf.mxu1 }
 0x12c   : > { %v571_v57 = vadd.f32 %v1421_v4, %v512_v56 }
 0x12e   : > { %v603_v59 = vmax.f32 %v571_v57, 0.0 }
 0x130   : > { %v626_v61 = vpack.c.bf16 %v603_v59, %v602_v58 }
 0x132   : > { %1076 = vmatmul.msk.bf16.gmra.mxu2 %vm323_vm0, %v626_v61 }
 0x133   : > { %v515_v62 = vpop.f32.mrf.mxu1 }
 0x134   : > { %v572_v6 = vadd.f32 %v1421_v4, %v515_v62 }
 0x135   : > { %v723_v0 = vpop.f32.mrf.mxu2 }
 0x136   : > { %v724_v1 = vadd.f32 %v723_v0, %v381_v23  ;;  %v604_v11 = vmax.f32 %v572_v6, 0.0 }
 0x138   : > { %v807_v2 = vadd.f32 %v1495_v63, %v724_v1 }
 0x13a   : > { %v839_v7 = vmax.f32 %v807_v2, 0.0 }
 0x13b   : > { %v517_v8 = vpop.f32.mrf.mxu1 }
 0x13c   : > { %871 = vst [vmem:[%s1501_s8] sm:$0xff] %v839_v7  ;;  %v573_v9 = vadd.f32 %v1421_v4, %v517_v8 }
 0x13d   : > { %v725_v10 = vpop.f32.mrf.mxu2 }
 0x13e   : > { %v605_v12 = vmax.f32 %v573_v9, 0.0  ;;  %v726_v13 = vadd.f32 %v725_v10, %v383_v35 }
 0x140   : > { %v627_v15 = vpack.c.bf16 %v605_v12, %v604_v11  ;;  %v808_v16 = vadd.f32 %v1495_v63, %v726_v13 }
 0x142   : > { %v840_v18 = vmax.f32 %v808_v16, 0.0  ;;  %1077 = vmatmul.msk.bf16.gmra.mxu2 %vm323_vm0, %v627_v15 }
 0x143   : > { %v520_v19 = vpop.f32.mrf.mxu1 }
 0x144   : > { %872 = vst [vmem:[%s1501_s8 + $0x8] sm:$0xff] %v840_v18  ;;  %v574_v24 = vadd.f32 %v1421_v4, %v520_v19 }
 0x145   : > { %v728_v21 = vpop.f32.mrf.mxu2 }
 0x146   : > { %v729_v22 = vadd.f32 %v728_v21, %v386_v43  ;;  %v606_v32 = vmax.f32 %v574_v24, 0.0  ;;  %v401_v43 = vpop.f32.mrf.mxu0 }
 0x148   : > { %v809_v23 = vadd.f32 %v1495_v63, %v729_v22 }
 0x14a   : > { %v841_v25 = vmax.f32 %v809_v23, 0.0 }
 0x14b   : > { %v522_v27 = vpop.f32.mrf.mxu1 }
 0x14c   : > { %873 = vst [vmem:[%s1501_s8 + $0x10] sm:$0xff] %v841_v25  ;;  %v575_v28 = vadd.f32 %v1421_v4, %v522_v27 }
 0x14d   : > { %v730_v30 = vpop.f32.mrf.mxu2 }
 0x14e   : > { %v607_v33 = vmax.f32 %v575_v28, 0.0  ;;  %v731_v34 = vadd.f32 %v730_v30, %v388_v54  ;;  %v403_v56 = vpop.f32.mrf.mxu0 }
 0x150   : > { %v628_v35 = vpack.c.bf16 %v607_v33, %v606_v32  ;;  %v810_v36 = vadd.f32 %v1495_v63, %v731_v34 }
 0x152   : > { %v842_v37 = vmax.f32 %v810_v36, 0.0  ;;  %1078 = vmatmul.msk.bf16.gmra.mxu2 %vm323_vm0, %v628_v35 }
 0x153   : > { %v525_v39 = vpop.f32.mrf.mxu1 }
 0x154   : > { %874 = vst [vmem:[%s1501_s8 + $0x18] sm:$0xff] %v842_v37  ;;  %v576_v45 = vadd.f32 %v1421_v4, %v525_v39 }
 0x155   : > { %v733_v40 = vpop.f32.mrf.mxu2 }
 0x156   : > { %v734_v42 = vadd.f32 %v733_v40, %v391_v60  ;;  %v608_v51 = vmax.f32 %v576_v45, 0.0  ;;  %v406_v61 = vpop.f32.mrf.mxu0 }
 0x158   : > { %v811_v44 = vadd.f32 %v1495_v63, %v734_v42 }
 0x15a   : > { %v843_v46 = vmax.f32 %v811_v44, 0.0 }
 0x15b   : > { %v527_v47 = vpop.f32.mrf.mxu1 }
 0x15c   : > { %875 = vst [vmem:[%s1501_s8 + $0x20] sm:$0xff] %v843_v46  ;;  %v577_v49 = vadd.f32 %v1421_v4, %v527_v47 }
 0x15d   : > { %v735_v50 = vpop.f32.mrf.mxu2 }
 0x15e   : > { %v609_v52 = vmax.f32 %v577_v49, 0.0  ;;  %v736_v53 = vadd.f32 %v735_v50, %v393_v3  ;;  %v408_v6 = vpop.f32.mrf.mxu0 }
 0x160   : > { %v629_v54 = vpack.c.bf16 %v609_v52, %v608_v51  ;;  %v812_v55 = vadd.f32 %v1495_v63, %v736_v53 }
 0x162   : > { %v844_v57 = vmax.f32 %v812_v55, 0.0  ;;  %1079 = vmatmul.msk.bf16.gmra.mxu2 %vm323_vm0, %v629_v54 }
 0x164   : > { %876 = vst [vmem:[%s1501_s8 + $0x28] sm:$0xff] %v844_v57 }
 0x165   : > { %v738_v58 = vpop.f32.mrf.mxu2 }
 0x166   : > { %v739_v59 = vadd.f32 %v738_v58, %v396_v20  ;;  %v411_v18 = vpop.f32.mrf.mxu0 }
 0x168   : > { %v813_v60 = vadd.f32 %v1495_v63, %v739_v59 }
 0x16a   : > { %v845_v4 = vmax.f32 %v813_v60, 0.0 }
 0x16c   : > { %877 = vst [vmem:[%s1501_s8 + $0x30] sm:$0xff] %v845_v4 }
 0x16d   : > { %v740_v62 = vpop.f32.mrf.mxu2 }
 0x16e   : > { %v741_v0 = vadd.f32 %v740_v62, %v398_v31  ;;  %v413_v28 = vpop.f32.mrf.mxu0 }
 0x170   : > { %v814_v1 = vadd.f32 %v1495_v63, %v741_v0 }
 0x172   : > { %v846_v2 = vmax.f32 %v814_v1, 0.0 }
 0x174   : > { %878 = vst [vmem:[%s1501_s8 + $0x38] sm:$0xff] %v846_v2 }
 0x175   : > { %v743_v3 = vpop.f32.mrf.mxu2 }
 0x176   : > { %v744_v7 = vadd.f32 %v743_v3, %v401_v43  ;;  %v416_v42 = vpop.f32.mrf.mxu0 }
 0x178   : > { %v815_v8 = vadd.f32 %v1495_v63, %v744_v7 }
 0x17a   : > { %v847_v9 = vmax.f32 %v815_v8, 0.0  ;;  %v783_v10 = vpop.f32.mrf.mxu3 }
 0x17b   : > { %v784_v11 = vadd.f32 %v783_v10, %v1424_v5 }
 0x17c   : > { %879 = vst [vmem:[%s1501_s8 + $0x40] sm:$0xff] %v847_v9 }
 0x17d   : > { %v831_v12 = vadd.f32 %v1495_v63, %v784_v11  ;;  %v745_v13 = vpop.f32.mrf.mxu2 }
 0x17e   : > { %v746_v15 = vadd.f32 %v745_v13, %v403_v56  ;;  %v418_v52 = vpop.f32.mrf.mxu0 }
 0x17f   : > { %v863_v16 = vmax.f32 %v831_v12, 0.0 }
 0x180   : > { %v816_v19 = vadd.f32 %v1495_v63, %v746_v15 }
 0x181   : > { %895 = vst [vmem:[%s1501_s8 + $0xc0] sm:$0xff] %v863_v16 }
 0x182   : > { %v848_v20 = vmax.f32 %v816_v19, 0.0  ;;  %v785_v21 = vpop.f32.mrf.mxu3 }
 0x183   : > { %v786_v22 = vadd.f32 %v785_v21, %v1430_v14 }
 0x184   : > { %880 = vst [vmem:[%s1501_s8 + $0x48] sm:$0xff] %v848_v20 }
 0x185   : > { %v832_v23 = vadd.f32 %v1495_v63, %v786_v22  ;;  %v748_v5 = vpop.f32.mrf.mxu2 }
 0x186   : > { %v749_v24 = vadd.f32 %v748_v5, %v406_v61  ;;  %v421_v61 = vpop.f32.mrf.mxu0 }
 0x187   : > { %v864_v25 = vmax.f32 %v832_v23, 0.0 }
 0x188   : > { %v817_v27 = vadd.f32 %v1495_v63, %v749_v24 }
 0x189   : > { %896 = vst [vmem:[%s1501_s8 + $0xc8] sm:$0xff] %v864_v25 }
 0x18a   : > { %v849_v30 = vmax.f32 %v817_v27, 0.0  ;;  %v788_v31 = vpop.f32.mrf.mxu3 }
 0x18b   : > { %v789_v32 = vadd.f32 %v788_v31, %v1435_v17 }
 0x18c   : > { %881 = vst [vmem:[%s1501_s8 + $0x50] sm:$0xff] %v849_v30 }
 0x18d   : > { %v833_v33 = vadd.f32 %v1495_v63, %v789_v32  ;;  %v750_v14 = vpop.f32.mrf.mxu2 }
 0x18e   : > { %v751_v34 = vadd.f32 %v750_v14, %v408_v6  ;;  %v423_v9 = vpop.f32.mrf.mxu0 }
 0x18f   : > { %v865_v35 = vmax.f32 %v833_v33, 0.0 }
 0x190   : > { %v818_v36 = vadd.f32 %v1495_v63, %v751_v34 }
 0x191   : > { %897 = vst [vmem:[%s1501_s8 + $0xd0] sm:$0xff] %v865_v35 }
 0x192   : > { %v850_v37 = vmax.f32 %v818_v36, 0.0  ;;  %v790_v39 = vpop.f32.mrf.mxu3 }
 0x193   : > { %v791_v40 = vadd.f32 %v790_v39, %v1441_v26 }
 0x194   : > { %882 = vst [vmem:[%s1501_s8 + $0x58] sm:$0xff] %v850_v37 }
 0x195   : > { %v834_v43 = vadd.f32 %v1495_v63, %v791_v40  ;;  %v753_v17 = vpop.f32.mrf.mxu2 }
 0x196   : > { %v754_v44 = vadd.f32 %v753_v17, %v411_v18  ;;  %v426_v20 = vpop.f32.mrf.mxu0 }
 0x197   : > { %v866_v45 = vmax.f32 %v834_v43, 0.0 }
 0x198   : > { %v819_v46 = vadd.f32 %v1495_v63, %v754_v44 }
 0x199   : > { %898 = vst [vmem:[%s1501_s8 + $0xd8] sm:$0xff] %v866_v45 }
 0x19a   : > { %v851_v47 = vmax.f32 %v819_v46, 0.0  ;;  %v793_v49 = vpop.f32.mrf.mxu3 }
 0x19b   : > { %v794_v50 = vadd.f32 %v793_v49, %v1446_v29 }
 0x19c   : > { %883 = vst [vmem:[%s1501_s8 + $0x60] sm:$0xff] %v851_v47 }
 0x19d   : > { %v835_v51 = vadd.f32 %v1495_v63, %v794_v50  ;;  %v755_v26 = vpop.f32.mrf.mxu2 }
 0x19e   : > { %v756_v53 = vadd.f32 %v755_v26, %v413_v28 }
 0x19f   : > { %v867_v54 = vmax.f32 %v835_v51, 0.0 }
 0x1a0   : > { %v820_v55 = vadd.f32 %v1495_v63, %v756_v53 }
 0x1a1   : > { %899 = vst [vmem:[%s1501_s8 + $0xe0] sm:$0xff] %v867_v54 }
 0x1a2   : > { %v852_v56 = vmax.f32 %v820_v55, 0.0  ;;  %v795_v57 = vpop.f32.mrf.mxu3 }
 0x1a3   : > { %v796_v58 = vadd.f32 %v795_v57, %v1452_v38 }
 0x1a4   : > { %884 = vst [vmem:[%s1501_s8 + $0x68] sm:$0xff] %v852_v56 }
 0x1a5   : > { %v836_v59 = vadd.f32 %v1495_v63, %v796_v58  ;;  %v758_v29 = vpop.f32.mrf.mxu2 }
 0x1a6   : > { %v759_v60 = vadd.f32 %v758_v29, %v416_v42 }
 0x1a7   : > { %v868_v4 = vmax.f32 %v836_v59, 0.0 }
 0x1a8   : > { %v821_v62 = vadd.f32 %v1495_v63, %v759_v60 }
 0x1a9   : > { %900 = vst [vmem:[%s1501_s8 + $0xe8] sm:$0xff] %v868_v4 }
 0x1aa   : > { %v853_v0 = vmax.f32 %v821_v62, 0.0  ;;  %v798_v1 = vpop.f32.mrf.mxu3 }
 0x1ab   : > { %v799_v2 = vadd.f32 %v798_v1, %v1457_v41 }
 0x1ac   : > { %885 = vst [vmem:[%s1501_s8 + $0x70] sm:$0xff] %v853_v0 }
 0x1ad   : > { %v837_v3 = vadd.f32 %v1495_v63, %v799_v2  ;;  %v760_v38 = vpop.f32.mrf.mxu2 }
 0x1ae   : > { %v761_v6 = vadd.f32 %v760_v38, %v418_v52 }
 0x1af   : > { %v869_v7 = vmax.f32 %v837_v3, 0.0 }
 0x1b0   : > { %v822_v8 = vadd.f32 %v1495_v63, %v761_v6 }
 0x1b1   : > { %901 = vst [vmem:[%s1501_s8 + $0xf0] sm:$0xff] %v869_v7 }
 0x1b2   : > { %v854_v10 = vmax.f32 %v822_v8, 0.0  ;;  %v800_v11 = vpop.f32.mrf.mxu3 }
 0x1b3   : > { %v801_v12 = vadd.f32 %v800_v11, %v1461_v48  ;;  %v428_v48 = vpop.f32.mrf.mxu0 }
 0x1b4   : > { %886 = vst [vmem:[%s1501_s8 + $0x78] sm:$0xff] %v854_v10 }
 0x1b5   : > { %v838_v41 = vadd.f32 %v1495_v63, %v801_v12  ;;  %v763_v13 = vpop.f32.mrf.mxu2 }
 0x1b6   : > { %v764_v15 = vadd.f32 %v763_v13, %v421_v61 }
 0x1b7   : > { %v870_v16 = vmax.f32 %v838_v41, 0.0 }
 0x1b8   : > { %v823_v18 = vadd.f32 %v1495_v63, %v764_v15 }
 0x1b9   : > { %902 = vst [vmem:[%s1501_s8 + $0xf8] sm:$0xff] %v870_v16 }
 0x1ba   : > { %v855_v19 = vmax.f32 %v823_v18, 0.0 }
 0x1bb   : > { %v431_v32 = vpop.f32.mrf.mxu0 }
 0x1bc   : > { %887 = vst [vmem:[%s1501_s8 + $0x80] sm:$0xff] %v855_v19 }
 0x1bd   : > { %v765_v21 = vpop.f32.mrf.mxu2 }
 0x1be   : > { %v766_v22 = vadd.f32 %v765_v21, %v423_v9 }
 0x1c0   : > { %v824_v23 = vadd.f32 %v1495_v63, %v766_v22 }
 0x1c2   : > { %v856_v5 = vmax.f32 %v824_v23, 0.0 }
 0x1c3   : > { %v433_v37 = vpop.f32.mrf.mxu0 }
 0x1c4   : > { %888 = vst [vmem:[%s1501_s8 + $0x88] sm:$0xff] %v856_v5 }
 0x1c5   : > { %v768_v24 = vpop.f32.mrf.mxu2 }
 0x1c6   : > { %v769_v25 = vadd.f32 %v768_v24, %v426_v20 }
 0x1c8   : > { %v825_v27 = vadd.f32 %v1495_v63, %v769_v25 }
 0x1ca   : > { %v857_v28 = vmax.f32 %v825_v27, 0.0 }
 0x1cb   : > { %v436_v44 = vpop.f32.mrf.mxu0 }
 0x1cc   : > { %889 = vst [vmem:[%s1501_s8 + $0x90] sm:$0xff] %v857_v28 }
 0x1cd   : > { %v770_v30 = vpop.f32.mrf.mxu2 }
 0x1ce   : > { %v771_v31 = vadd.f32 %v770_v30, %v428_v48 }
 0x1d0   : > { %v826_v33 = vadd.f32 %v1495_v63, %v771_v31 }
 0x1d2   : > { %v858_v14 = vmax.f32 %v826_v33, 0.0 }
 0x1d3   : > { %v438_v50 = vpop.f32.mrf.mxu0 }
 0x1d4   : > { %890 = vst [vmem:[%s1501_s8 + $0x98] sm:$0xff] %v858_v14 }
 0x1d5   : > { %v773_v34 = vpop.f32.mrf.mxu2 }
 0x1d6   : > { %v774_v35 = vadd.f32 %v773_v34, %v431_v32 }
 0x1d8   : > { %v827_v36 = vadd.f32 %v1495_v63, %v774_v35 }
 0x1da   : > { %v859_v39 = vmax.f32 %v827_v36, 0.0 }
 0x1dc   : > { %891 = vst [vmem:[%s1501_s8 + $0xa0] sm:$0xff] %v859_v39 }
 0x1dd   : > { %v775_v40 = vpop.f32.mrf.mxu2 }
 0x1de   : > { %v776_v42 = vadd.f32 %v775_v40, %v433_v37 }
 0x1e0   : > { %v828_v43 = vadd.f32 %v1495_v63, %v776_v42 }
 0x1e2   : > { %v860_v17 = vmax.f32 %v828_v43, 0.0 }
 0x1e4   : > { %892 = vst [vmem:[%s1501_s8 + $0xa8] sm:$0xff] %v860_v17 }
 0x1e5   : > { %v778_v45 = vpop.f32.mrf.mxu2 }
 0x1e6   : > { %v779_v46 = vadd.f32 %v778_v45, %v436_v44 }
 0x1e8   : > { %v829_v47 = vadd.f32 %v1495_v63, %v779_v46 }
 0x1ea   : > { %v861_v49 = vmax.f32 %v829_v47, 0.0 }
 0x1ec   : > { %893 = vst [vmem:[%s1501_s8 + $0xb0] sm:$0xff] %v861_v49 }
 0x1ed   : > { %v780_v51 = vpop.f32.mrf.mxu2 }
 0x1ee   : > { %v781_v26 = vadd.f32 %v780_v51, %v438_v50 }
 0x1f0   : > { %v830_v52 = vadd.f32 %v1495_v63, %v781_v26 }
 0x1f2   : > { %v862_v53 = vmax.f32 %v830_v52, 0.0 }
 0x1f4   : > { %894 = vst [vmem:[%s1501_s8 + $0xb8] sm:$0xff] %v862_v53 }
 0x1f5   : > { %1184 = shalt.err (!%p1181_p3)
}
 0x1f6   : > { %s1221_s26 = smov 128   ;;  %s1222_s7 = smov 8  }
 0x1f7   : > { %1114 = dma.vmem_to_hbm [thread:$0]  (%p1291_p5), %s917_s13, 4096, %s919_s14, %s904_s22, %s1221_s26, %s1221_s26, %s1222_s7  }
 0x1f8 PF: > { %p1120_p4 = scmp.ge.s32.totalorder %s1219_s21, 2  ;;  %s933_s8 = sand.u32 1, %s1207_s18  }
 0x1f9   : > { %s934_s9 = scalar_lea.sflag [#allocation3], %s933_s8 }
 0x1fa   : > { %p1117_p7 = pnand %p1120_p4, %p1295_p6 }
 0x1fc   : > { %p1118_p8 = pneg %p1117_p7 }
 0x1fe   : > { %1202 = dma.done.wait (%p1118_p8), %s934_s9, 4096  }
 0x1ff   : > { %1204 = vsyncadd (%p1118_p8), %s934_s9, 4294963200  ;;  %p15_p9 = scmp.ge.s32.totalorder %s1278_s24, 4   ;;  %s1624_s18 = smov %s1211_s19 }
 0x200   : > { %s1625_s19 = smov %s1215_s20  ;;  %s1626_s20 = smov %s1289_s27 }
 0x201   : > { %s1627_s21 = smov %s1278_s24  ;;  %17 = sbr.rel (!%p15_p9) target bundleno = 3 (0x3), region = 75 }
 0x206   :  { %940 = vsyncpa [#allocation3], 1 }
 0x207   :  { %942 = vsyncpa [#allocation3 + $0x1], 1 }

</bundles_post_ra>
